<compile_context>
chip_gen: v5e
topology: v5e:2x2
jax: 0.10.0
libtpu: 0.0.40
codegen_flags: <defaults>
</compile_context>

<pallas_src>
import functools
import math

import jax
import jax.numpy as jnp
from jax import lax
from jax.experimental import pallas as pl
from jax.experimental.pallas import tpu as pltpu


def _round_up(x, m):
    return ((x + m - 1) // m) * m


def _vmem_limit(cap_bytes):
    """Generation-aware scoped-VMEM limit: min(cap, 75% of physical VMEM)."""
    phys = 64 * 1024 * 1024
    try:
        phys = int(pltpu.get_tpu_info().vmem_capacity_bytes)
    except Exception:  # API drift safety: fall back to the smallest (v7x) budget
        pass
    return int(min(cap_bytes, (phys * 3) // 4))


def _resident_spec(block_shape, index_map):
    """BlockSpec for an operand whose block index never changes: single-buffer."""
    try:
        return pl.BlockSpec(block_shape, index_map, pipeline_mode=pl.Buffered(1))
    except Exception:  # older jax without pipeline_mode / Buffered
        return pl.BlockSpec(block_shape, index_map)


def _pad_rows(x2d, mult):
    n = x2d.shape[0]
    n_pad = _round_up(n, mult)
    if n_pad != n:
        x2d = jnp.pad(x2d, ((0, n_pad - n), (0, 0)))
    return x2d, n


# ----------------------------------------------------------------------------
# Projection kernels: row-tiled, pipelined, bf16 operands / f32 accumulate
# ----------------------------------------------------------------------------
def _qkv_proj_kernel(x_ref, wq_ref, wk_ref, wv_ref, bq_ref, bk_ref, bv_ref,
                     q_ref, k_ref, v_ref):
    x = x_ref[...]                                          # (rows, d_in) bf16

    def proj(w_ref, b_ref):
        return (jnp.dot(x, w_ref[...], preferred_element_type=jnp.float32)
                + b_ref[...])

    q_ref[...] = proj(wq_ref, bq_ref).astype(q_ref.dtype)
    k_ref[...] = proj(wk_ref, bk_ref).astype(k_ref.dtype)
    v_ref[...] = proj(wv_ref, bv_ref).astype(v_ref.dtype)


def qkv_projection(x2d, wq_t, wk_t, wv_t, bq, bk, bv, *, row_tile):
    """Fused Q/K/V projection: one pass over x, three bf16 outputs."""
    n, d_in = x2d.shape
    d_out = wq_t.shape[1]
    x_spec = pl.BlockSpec((row_tile, d_in), lambda i: (i, 0))
    w_spec = _resident_spec((d_in, d_out), lambda i: (0, 0))
    b_spec = _resident_spec((1, d_out), lambda i: (0, 0))
    o_spec = pl.BlockSpec((row_tile, d_out), lambda i: (i, 0))
    o_sds = jax.ShapeDtypeStruct((n, d_out), jnp.bfloat16)
    return pl.pallas_call(
        _qkv_proj_kernel,
        out_shape=(o_sds, o_sds, o_sds),
        grid=(n // row_tile,),
        in_specs=[x_spec, w_spec, w_spec, w_spec, b_spec, b_spec, b_spec],
        out_specs=(o_spec, o_spec, o_spec),
        compiler_params=pltpu.CompilerParams(
            dimension_semantics=("parallel",),
            vmem_limit_bytes=_vmem_limit(96 * 1024 * 1024),
        ),
    )(x2d, wq_t, wk_t, wv_t, bq, bk, bv)


def _linear_kernel(x_ref, w_ref, b_ref, o_ref):
    o_ref[...] = (jnp.dot(x_ref[...], w_ref[...],
                          preferred_element_type=jnp.float32)
                  + b_ref[...]).astype(o_ref.dtype)


def linear_pallas(x2d, w_t, b_row, *, row_tile):
    n, d_in = x2d.shape
    d_out = w_t.shape[1]
    return pl.pallas_call(
        _linear_kernel,
        out_shape=jax.ShapeDtypeStruct((n, d_out), jnp.float32),
        grid=(n // row_tile,),
        in_specs=[pl.BlockSpec((row_tile, d_in), lambda i: (i, 0)),
                  _resident_spec((d_in, d_out), lambda i: (0, 0)),
                  _resident_spec((1, d_out), lambda i: (0, 0))],
        out_specs=pl.BlockSpec((row_tile, d_out), lambda i: (i, 0)),
        compiler_params=pltpu.CompilerParams(
            dimension_semantics=("parallel",),
            vmem_limit_bytes=_vmem_limit(96 * 1024 * 1024),
        ),
    )(x2d, w_t, b_row)


# ----------------------------------------------------------------------------
# Low-rank (Performer) state build:  kv = phi(k)^T v  /  ksum = sum phi(k)
# ----------------------------------------------------------------------------
def _lowrank_build_kernel(len_ref, k_ref, v_ref, wf_ref, kv_ref, ksum_ref):
    b = pl.program_id(0)
    ki = pl.program_id(1)

    tk = k_ref.shape[1]
    H = kv_ref.shape[1]
    Dh = kv_ref.shape[2]
    M = kv_ref.shape[3]

    @pl.when(ki == 0)
    def _():
        kv_ref[...] = jnp.zeros_like(kv_ref)
        ksum_ref[...] = jnp.zeros_like(ksum_ref)

    valid_len = len_ref[b]
    k0 = ki * tk
    scl = jnp.float32(1.0 / math.sqrt(math.sqrt(Dh)))
    inv_sqrt_m = jnp.float32(1.0 / math.sqrt(M))

    wf = wf_ref[...]                                                 # (Dh, M) f32
    kvalid = (k0 + lax.broadcasted_iota(jnp.int32, (tk, 1), 0)) < valid_len
    k_all = jnp.where(kvalid, k_ref[0].astype(jnp.float32) * scl, 0.0)   # (tk, HD)
    v_all = v_ref[0]                                                 # (tk, HD) bf16

    for h in range(H):
        kh = k_all[:, h * Dh:(h + 1) * Dh]                           # (tk, Dh) f32
        vh = v_all[:, h * Dh:(h + 1) * Dh]                           # (tk, Dh) bf16
        k_half = 0.5 * jnp.sum(kh * kh, axis=-1, keepdims=True)
        kp = jnp.exp(jnp.dot(kh, wf, preferred_element_type=jnp.float32)
                     - k_half) * inv_sqrt_m                          # (tk, M) f32
        kp = jnp.where(kvalid, kp, 0.0)
        kv_ref[0, h] = kv_ref[0, h] + lax.dot_general(
            vh, kp.astype(jnp.bfloat16), (((0,), (0,)), ((), ())),
            preferred_element_type=jnp.float32)                      # (Dh, M)
        ksum_ref[0, h] = ksum_ref[0, h] + jnp.sum(kp, axis=0, keepdims=True)


def lowrank_build(K, V, wf, lengths, *, key_tile):
    B, Lp, HD = K.shape
    Dh, M = wf.shape
    H = HD // Dh
    nk = Lp // key_tile
    grid_spec = pltpu.PrefetchScalarGridSpec(
        num_scalar_prefetch=1,
        grid=(B, nk),
        in_specs=[
            pl.BlockSpec((1, key_tile, HD), lambda b, ki, lens: (b, ki, 0)),
            pl.BlockSpec((1, key_tile, HD), lambda b, ki, lens: (b, ki, 0)),
            _resident_spec((Dh, M), lambda b, ki, lens: (0, 0)),
        ],
        out_specs=[
            pl.BlockSpec((1, H, Dh, M), lambda b, ki, lens: (b, 0, 0, 0)),
            pl.BlockSpec((1, H, 1, M), lambda b, ki, lens: (b, 0, 0, 0)),
        ],
    )
    return pl.pallas_call(
        _lowrank_build_kernel,
        out_shape=(jax.ShapeDtypeStruct((B, H, Dh, M), jnp.float32),
                   jax.ShapeDtypeStruct((B, H, 1, M), jnp.float32)),
        grid_spec=grid_spec,
        compiler_params=pltpu.CompilerParams(
            dimension_semantics=("parallel", "arbitrary"),
            vmem_limit_bytes=_vmem_limit(64 * 1024 * 1024),
        ),
    )(lengths, K, V, wf)


# ----------------------------------------------------------------------------
# ScatterBrain local attention kernel: banded exact softmax + factored low-rank
# ----------------------------------------------------------------------------
def _sb_local_attn_kernel(len_ref, q_ref, k_hbm_ref, v_hbm_ref, kv_ref, ksum_ref,
                          wf_ref, o_ref, kband_ref, vband_ref, sem,
                          *, window, band_w):
    b = pl.program_id(0)
    qi = pl.program_id(1)
    nq = pl.num_programs(1)

    tq = q_ref.shape[1]
    H = kv_ref.shape[1]
    Dh = kv_ref.shape[2]
    M = kv_ref.shape[3]
    Lp = k_hbm_ref.shape[1]
    Bw = band_w
    half = window // 2

    scl = jnp.float32(1.0 / math.sqrt(math.sqrt(Dh)))   # sqrt of softmax temperature
    inv_sqrt_m = jnp.float32(1.0 / math.sqrt(M))
    neg_big = jnp.float32(-1e30)
    eps = jnp.float32(1e-30)

    def band_start(q_idx):
        lo = jnp.maximum(q_idx * tq - half, 0)
        s = jnp.minimum((lo // 8) * 8, Lp - Bw)          # 8-aligned, in bounds
        return pl.multiple_of(s, 8)

    def issue_band(q_idx, slot_idx):
        s = band_start(q_idx)
        pltpu.make_async_copy(k_hbm_ref.at[b, pl.ds(s, Bw), :],
                              kband_ref.at[slot_idx], sem.at[0, slot_idx]).start()
        pltpu.make_async_copy(v_hbm_ref.at[b, pl.ds(s, Bw), :],
                              vband_ref.at[slot_idx], sem.at[1, slot_idx]).start()

    slot = qi % 2

    @pl.when(qi == 0)
    def _():
        issue_band(qi, 0)

    # ---- q-side prep (no band needed; overlaps the in-flight band DMA) -----
    valid_len = len_ref[b]
    q0 = qi * tq
    wf = wf_ref[...]                                      # (Dh, M) f32
    q_all = q_ref[0].astype(jnp.float32) * scl            # (tq, HD)

    q_heads, q_feat = [], []
    for h in range(H):
        qh = q_all[:, h * Dh:(h + 1) * Dh]
        q_half = 0.5 * jnp.sum(qh * qh, axis=-1, keepdims=True)
        q_feat.append(jnp.dot(qh, wf, preferred_element_type=jnp.float32) - q_half)
        q_heads.append(qh)

    # ---- wait for this tile's K/V band; prefetch the next tile's band ------
    pltpu.make_async_copy(k_hbm_ref.at[b, pl.ds(0, Bw), :],
                          kband_ref.at[slot], sem.at[0, slot]).wait()
    pltpu.make_async_copy(v_hbm_ref.at[b, pl.ds(0, Bw), :],
                          vband_ref.at[slot], sem.at[1, slot]).wait()

    @pl.when(qi + 1 < nq)
    def _():
        issue_band(qi + 1, 1 - slot)

    start = band_start(qi)
    kb_valid = (start + lax.broadcasted_iota(jnp.int32, (Bw, 1), 0)) < valid_len
    k_band = jnp.where(kb_valid, kband_ref[slot].astype(jnp.float32) * scl, 0.0)
    v_band = vband_ref[slot]                              # (Bw, HD) bf16

    qrow = q0 + lax.broadcasted_iota(jnp.int32, (tq, Bw), 0)
    kcol = start + lax.broadcasted_iota(jnp.int32, (tq, Bw), 1)
    band = (kcol >= qrow - half) & (kcol < qrow - half + window)
    mask = band & (kcol < valid_len)

    outs = []
    for h in range(H):
        qh = q_heads[h]                                   # (tq, Dh) f32 (scaled)
        kbh = k_band[:, h * Dh:(h + 1) * Dh]              # (Bw, Dh) f32 (scaled)
        vbh = v_band[:, h * Dh:(h + 1) * Dh]              # (Bw, Dh) bf16

        # exact softmax weights inside the local window (bf16 MXU, f32 acc)
        s = lax.dot_general(qh.astype(jnp.bfloat16), kbh.astype(jnp.bfloat16),
                            (((1,), (1,)), ((), ())),
                            preferred_element_type=jnp.float32)      # (tq, Bw)
        c = jnp.maximum(jnp.max(jnp.where(mask, s, neg_big), axis=-1,
                                keepdims=True), 0.0)                 # (tq, 1)
        w_ex = jnp.exp(jnp.where(mask, s - c, neg_big))              # 0 off-band
        num = jnp.dot(w_ex.astype(jnp.bfloat16), vbh,
                      preferred_element_type=jnp.float32)            # (tq, Dh)
        den = jnp.sum(w_ex, axis=-1, keepdims=True)

        # Performer features; per-row shift exp(-c) folded into the exponent
        qp = jnp.exp(q_feat[h] - c) * inv_sqrt_m                     # (tq, M) f32
        kb_half = 0.5 * jnp.sum(kbh * kbh, axis=-1, keepdims=True)
        kpb = jnp.exp(jnp.dot(kbh, wf, preferred_element_type=jnp.float32)
                      - kb_half) * inv_sqrt_m
        kpb = jnp.where(kb_valid, kpb, 0.0)                          # (Bw, M)

        qp_b = qp.astype(jnp.bfloat16)
        low_num = lax.dot_general(qp_b, kv_ref[0, h].astype(jnp.bfloat16),
                                  (((1,), (1,)), ((), ())),
                                  preferred_element_type=jnp.float32)  # (tq, Dh)
        low_den = jnp.sum(qp * ksum_ref[0, h], axis=-1, keepdims=True)

        lb = lax.dot_general(qp_b, kpb.astype(jnp.bfloat16),
                             (((1,), (1,)), ((), ())),
                             preferred_element_type=jnp.float32)       # (tq, Bw)
        lb = jnp.where(mask, lb, 0.0)
        sub_num = jnp.dot(lb.astype(jnp.bfloat16), vbh,
                          preferred_element_type=jnp.float32)
        sub_den = jnp.sum(lb, axis=-1, keepdims=True)

        num_t = num + low_num - sub_num
        den_t = den + low_den - sub_den
        outs.append(num_t * pl.reciprocal(den_t + eps, approx=True))

    o_ref[0] = jnp.concatenate(outs, axis=-1).astype(o_ref.dtype)


def sb_local_attention(Q, K, V, kv, ksum, wf, lengths, window, q_tile):
    """Q,K,V: (B, Lp, H*Dh) bf16; kv: (B,H,Dh,M) f32; ksum: (B,H,1,M) f32."""
    B, Lp, HD = Q.shape
    Dh, M = wf.shape
    H = HD // Dh
    tq = q_tile
    nq = Lp // tq
    band_w = min(_round_up(tq + window - 1 + 7, 8), Lp)

    kern = functools.partial(_sb_local_attn_kernel, window=window, band_w=band_w)
    grid_spec = pltpu.PrefetchScalarGridSpec(
        num_scalar_prefetch=1,
        grid=(B, nq),
        in_specs=[
            pl.BlockSpec((1, tq, HD), lambda b, qi, lens: (b, qi, 0)),
            pl.BlockSpec(memory_space=pl.ANY),     # K stays in HBM; band-DMA'd
            pl.BlockSpec(memory_space=pl.ANY),     # V stays in HBM; band-DMA'd
            pl.BlockSpec((1, H, Dh, M), lambda b, qi, lens: (b, 0, 0, 0)),
            pl.BlockSpec((1, H, 1, M), lambda b, qi, lens: (b, 0, 0, 0)),
            _resident_spec((Dh, M), lambda b, qi, lens: (0, 0)),
        ],
        out_specs=pl.BlockSpec((1, tq, HD), lambda b, qi, lens: (b, qi, 0)),
        scratch_shapes=[
            pltpu.VMEM((2, band_w, HD), jnp.bfloat16),   # K band, double-buffered
            pltpu.VMEM((2, band_w, HD), jnp.bfloat16),   # V band, double-buffered
            pltpu.SemaphoreType.DMA((2, 2)),
        ],
    )
    return pl.pallas_call(
        kern,
        out_shape=jax.ShapeDtypeStruct((B, Lp, HD), jnp.bfloat16),
        grid_spec=grid_spec,
        compiler_params=pltpu.CompilerParams(
            dimension_semantics=("parallel", "arbitrary"),
            vmem_limit_bytes=_vmem_limit(48 * 1024 * 1024),
        ),
    )(lengths, Q, K, V, kv, ksum, wf)


# ----------------------------------------------------------------------------
# Module wrapper (parameter setup + glue in plain JAX; no HBM relayouts)
# ----------------------------------------------------------------------------
def init_params(key, config, nb_features=128):
    dim = config["dim"]
    hdim = config["num_head"] * config["head_dim"]
    ks = jax.random.split(key, 9)

    def linear_init(kw, kb, fan_in, fan_out):
        bound = 1.0 / math.sqrt(fan_in)
        w = jax.random.uniform(kw, (fan_out, fan_in), jnp.float32, -bound, bound)
        b = jax.random.uniform(kb, (fan_out,), jnp.float32, -bound, bound)
        # store W^T pre-cast to bf16 (native MXU operand), bias as f32 row
        return jnp.transpose(w).astype(jnp.bfloat16), b.reshape(1, fan_out)

    wq_t, bq = linear_init(ks[0], ks[1], dim, hdim)
    wk_t, bk = linear_init(ks[2], ks[3], dim, hdim)
    wv_t, bv = linear_init(ks[4], ks[5], dim, hdim)
    wo_t, bo = linear_init(ks[6], ks[7], hdim, dim)
    wf = jax.random.normal(ks[8], (config["head_dim"], nb_features), jnp.float32)
    return dict(wq_t=wq_t, bq=bq, wk_t=wk_t, bk=bk, wv_t=wv_t, bv=bv,
                wo_t=wo_t, bo=bo, wf=wf)


def _project_qkv(params, X, config):
    B, L, dim = X.shape
    H, Dh = config["num_head"], config["head_dim"]
    HD = H * Dh
    window = config["window_size"]
    # q-tile: multiple of 8, capped near the window size (band occupancy)
    tq = _round_up(min(config.get("q_tile", 128), L, max(2 * window, 16)), 8)
    Lp = _round_up(L, tq)
    Xp = X if Lp == L else jnp.pad(X, ((0, 0), (0, Lp - L), (0, 0)))
    x2 = Xp.reshape(B * Lp, dim).astype(jnp.bfloat16)

    row_tile = 256
    x2p, n_rows = _pad_rows(x2, row_tile)
    Qf, Kf, Vf = qkv_projection(x2p, params["wq_t"], params["wk_t"], params["wv_t"],
                                params["bq"], params["bk"], params["bv"],
                                row_tile=row_tile)
    Q = Qf[:n_rows].reshape(B, Lp, HD)
    K = Kf[:n_rows].reshape(B, Lp, HD)
    V = Vf[:n_rows].reshape(B, Lp, HD)
    return Q, K, V, tq


def _attention_core(params, Q, K, V, lengths, config, tq):
    Lp = Q.shape[1]
    key_tile = next((c for c in (512, 256, 128, 64)
                     if c < Lp and Lp % c == 0), tq)
    kv, ksum = lowrank_build(K, V, params["wf"], lengths, key_tile=key_tile)
    return sb_local_attention(Q, K, V, kv, ksum, params["wf"], lengths,
                              config["window_size"], tq)


def attention_forward(params, X, mask, config):
    B, L, dim = X.shape
    Q, K, V, tq = _project_qkv(params, X, config)

    # LengthMask(mask.sum(-1), max_len=L)
    lengths = jnp.sum(mask, axis=-1).astype(jnp.int32)

    attn = _attention_core(params, Q, K, V, lengths, config, tq)   # (B, Lp, HD) bf16

    Bp, Lp, HD = attn.shape
    row_tile = 256
    a2, n_rows = _pad_rows(attn.reshape(Bp * Lp, HD), row_tile)
    out = linear_pallas(a2, params["wo_t"], params["bo"], row_tile=row_tile)
    return out[:n_rows].reshape(B, Lp, dim)[:, :L, :]


# ----------------------------------------------------------------------------
# Plain-JAX reference for the attention operator (used only as a self-check)
# ----------------------------------------------------------------------------
def sb_local_attention_reference(Q, K, V, wf, lengths, window):
    B, L, HD = Q.shape
    Dh, M = wf.shape
    H = HD // Dh
    q = Q.reshape(B, L, H, Dh).transpose(0, 2, 1, 3).astype(jnp.float32)
    k = K.reshape(B, L, H, Dh).transpose(0, 2, 1, 3).astype(jnp.float32)
    v = V.reshape(B, L, H, Dh).transpose(0, 2, 1, 3).astype(jnp.float32)
    sq = 1.0 / math.sqrt(math.sqrt(Dh))
    qs, ks = q * sq, k * sq
    valid = jnp.arange(L)[None, :] < lengths[:, None]
    ks = jnp.where(valid[:, None, :, None], ks, 0.0)
    s = jnp.einsum("bhqd,bhkd->bhqk", qs, ks)
    qp = jnp.exp(jnp.einsum("bhqd,dm->bhqm", qs, wf)
                 - 0.5 * jnp.sum(qs * qs, -1, keepdims=True)) / math.sqrt(M)
    kp = jnp.exp(jnp.einsum("bhkd,dm->bhkm", ks, wf)
                 - 0.5 * jnp.sum(ks * ks, -1, keepdims=True)) / math.sqrt(M)
    kp = jnp.where(valid[:, None, :, None], kp, 0.0)
    low = jnp.einsum("bhqm,bhkm->bhqk", qp, kp)
    row = jnp.arange(L)[:, None]
    col = jnp.arange(L)[None, :]
    band = (col >= row - window // 2) & (col < row - window // 2 + window)
    kv_mask = valid[:, None, None, :]
    c = jnp.maximum(jnp.max(jnp.where(band[None, None] & kv_mask, s, -1e30),
                            -1, keepdims=True), 0.0)
    w = jnp.where(kv_mask,
                  jnp.where(band[None, None], jnp.exp(s - c), low * jnp.exp(-c)),
                  0.0)
    out = jnp.einsum("bhqk,bhkd->bhqd", w, v) / jnp.sum(w, -1, keepdims=True)
    return out.transpose(0, 2, 1, 3).reshape(B, L, HD)


def _run_and_check(key, config, B, L, lengths):
    kx, kparam = jax.random.split(key)
    X = jax.random.normal(kx, (B, L, config["dim"]), jnp.float32)
    mask = (jnp.arange(L)[None, :] < lengths[:, None]).astype(jnp.float32)
    params = init_params(kparam, config)

    out = attention_forward(params, X, mask, config)
    jax.block_until_ready(out)
    assert out.shape == (B, L, config["dim"])
    assert bool(jnp.all(jnp.isfinite(out)))

    # Cross-check the Pallas attention path (bf16 storage + bf16 MXU operands,
    # approx reciprocal) against the f32 reference on the same bf16 Q/K/V.
    Q, K, V, tq = _project_qkv(params, X, config)
    attn_k = _attention_core(params, Q, K, V, lengths, config, tq)
    attn_r = sb_local_attention_reference(Q[:, :L], K[:, :L], V[:, :L],
                                          params["wf"], lengths,
                                          config["window_size"])
    diff = jnp.abs(attn_k[:, :L].astype(jnp.float32) - attn_r)
    max_err = float(jnp.max(diff))
    mean_err = float(jnp.mean(diff))
    assert max_err < 1.5e-1 and mean_err < 1.5e-2, (max_err, mean_err)
    return True


# ----------------------------------------------------------------------------
if __name__ == "__main__":
    key = jax.random.PRNGKey(0)
    k1, k2 = jax.random.split(key)

    # config 1: toy shapes matching the PyTorch module (single q-tile, full band)
    cfg1 = dict(dim=32, head_dim=8, num_head=4, window_size=4, q_tile=128)
    ok1 = _run_and_check(k1, cfg1, B=2, L=16, lengths=jnp.array([16, 11], jnp.int32))

    # config 2: longer sequence exercising the dynamic band, the cross-tile band
    # prefetch (double buffer) and the multi-tile kv/ksum accumulation.
    cfg2 = dict(dim=32, head_dim=8, num_head=4, window_size=8, q_tile=32)
    ok2 = _run_and_check(k2, cfg2, B=2, L=128, lengths=jnp.array([128, 93], jnp.int32))

    if ok1 and ok2:
        print("KERNEL_OK")
</pallas_src>

<mosaic_0001>
module attributes {stable_mosaic.version = 11 : i64} {
  func.func @_qkv_proj_kernel(%arg0: i32, %arg1: memref<256x32xbf16, #tpu.memory_space<vmem>>, %arg2: memref<32x32xbf16, #tpu.memory_space<vmem>>, %arg3: memref<32x32xbf16, #tpu.memory_space<vmem>>, %arg4: memref<32x32xbf16, #tpu.memory_space<vmem>>, %arg5: memref<1x32xf32, #tpu.memory_space<vmem>>, %arg6: memref<1x32xf32, #tpu.memory_space<vmem>>, %arg7: memref<1x32xf32, #tpu.memory_space<vmem>>, %arg8: memref<256x32xbf16, #tpu.memory_space<vmem>>, %arg9: memref<256x32xbf16, #tpu.memory_space<vmem>>, %arg10: memref<256x32xbf16, #tpu.memory_space<vmem>>) attributes {dimension_semantics = [#tpu.dimension_semantics<parallel>], iteration_bounds = array<i64: 1>, scalar_prefetch = 0 : i64, scratch_operands = 0 : i64, tpu.core_type = #tpu.core_type<tc>, window_params = [{transform_indices = @transform_0, window_bounds = array<i64: 256, 32>}, {pipeline_mode = #tpu.pipeline_mode<synchronous>, transform_indices = @transform_1, window_bounds = array<i64: 32, 32>}, {pipeline_mode = #tpu.pipeline_mode<synchronous>, transform_indices = @transform_2, window_bounds = array<i64: 32, 32>}, {pipeline_mode = #tpu.pipeline_mode<synchronous>, transform_indices = @transform_3, window_bounds = array<i64: 32, 32>}, {pipeline_mode = #tpu.pipeline_mode<synchronous>, transform_indices = @transform_4, window_bounds = array<i64: 1, 32>}, {pipeline_mode = #tpu.pipeline_mode<synchronous>, transform_indices = @transform_5, window_bounds = array<i64: 1, 32>}, {pipeline_mode = #tpu.pipeline_mode<synchronous>, transform_indices = @transform_6, window_bounds = array<i64: 1, 32>}, {transform_indices = @transform_7, window_bounds = array<i64: 256, 32>}, {transform_indices = @transform_8, window_bounds = array<i64: 256, 32>}, {transform_indices = @transform_9, window_bounds = array<i64: 256, 32>}]} {
    %c0 = arith.constant 0 : index
    %c0_0 = arith.constant 0 : index
    %0 = vector.load %arg1[%c0, %c0_0] : memref<256x32xbf16, #tpu.memory_space<vmem>>, vector<256x32xbf16>
    %c0_1 = arith.constant 0 : index
    %c0_2 = arith.constant 0 : index
    %1 = vector.load %arg2[%c0_1, %c0_2] : memref<32x32xbf16, #tpu.memory_space<vmem>>, vector<32x32xbf16>
    %cst = arith.constant dense<0.000000e+00> : vector<256x32xf32>
    %2 = tpu.matmul %0, %1, %cst {dimension_numbers = #tpu.dot_dimension_numbers<[1], [0], [0], [1], [0, 0, 1, 1], [], []>} : vector<256x32xbf16>, vector<32x32xbf16>, vector<256x32xf32> -> vector<256x32xf32>
    %c0_3 = arith.constant 0 : index
    %c0_4 = arith.constant 0 : index
    %3 = vector.load %arg5[%c0_3, %c0_4] : memref<1x32xf32, #tpu.memory_space<vmem>>, vector<1x32xf32>
    %4 = vector.broadcast %3 : vector<1x32xf32> to vector<256x32xf32>
    %5 = arith.addf %2, %4 : vector<256x32xf32>
    %6 = arith.truncf %5 : vector<256x32xf32> to vector<256x32xbf16>
    %c0_5 = arith.constant 0 : index
    %c0_6 = arith.constant 0 : index
    %7 = vector.load %arg8[%c0_5, %c0_6] : memref<256x32xbf16, #tpu.memory_space<vmem>>, vector<256x32xbf16>
    tpu.vector_store %arg8[%c0_5, %c0_6], %6 {strides = array<i32>} : memref<256x32xbf16, #tpu.memory_space<vmem>>, vector<256x32xbf16>,
    %c0_7 = arith.constant 0 : index
    %c0_8 = arith.constant 0 : index
    %8 = vector.load %arg3[%c0_7, %c0_8] : memref<32x32xbf16, #tpu.memory_space<vmem>>, vector<32x32xbf16>
    %cst_9 = arith.constant dense<0.000000e+00> : vector<256x32xf32>
    %9 = tpu.matmul %0, %8, %cst_9 {dimension_numbers = #tpu.dot_dimension_numbers<[1], [0], [0], [1], [0, 0, 1, 1], [], []>} : vector<256x32xbf16>, vector<32x32xbf16>, vector<256x32xf32> -> vector<256x32xf32>
    %c0_10 = arith.constant 0 : index
    %c0_11 = arith.constant 0 : index
    %10 = vector.load %arg6[%c0_10, %c0_11] : memref<1x32xf32, #tpu.memory_space<vmem>>, vector<1x32xf32>
    %11 = vector.broadcast %10 : vector<1x32xf32> to vector<256x32xf32>
    %12 = arith.addf %9, %11 : vector<256x32xf32>
    %13 = arith.truncf %12 : vector<256x32xf32> to vector<256x32xbf16>
    %c0_12 = arith.constant 0 : index
    %c0_13 = arith.constant 0 : index
    %14 = vector.load %arg9[%c0_12, %c0_13] : memref<256x32xbf16, #tpu.memory_space<vmem>>, vector<256x32xbf16>
    tpu.vector_store %arg9[%c0_12, %c0_13], %13 {strides = array<i32>} : memref<256x32xbf16, #tpu.memory_space<vmem>>, vector<256x32xbf16>,
    %c0_14 = arith.constant 0 : index
    %c0_15 = arith.constant 0 : index
    %15 = vector.load %arg4[%c0_14, %c0_15] : memref<32x32xbf16, #tpu.memory_space<vmem>>, vector<32x32xbf16>
    %cst_16 = arith.constant dense<0.000000e+00> : vector<256x32xf32>
    %16 = tpu.matmul %0, %15, %cst_16 {dimension_numbers = #tpu.dot_dimension_numbers<[1], [0], [0], [1], [0, 0, 1, 1], [], []>} : vector<256x32xbf16>, vector<32x32xbf16>, vector<256x32xf32> -> vector<256x32xf32>
    %c0_17 = arith.constant 0 : index
    %c0_18 = arith.constant 0 : index
    %17 = vector.load %arg7[%c0_17, %c0_18] : memref<1x32xf32, #tpu.memory_space<vmem>>, vector<1x32xf32>
    %18 = vector.broadcast %17 : vector<1x32xf32> to vector<256x32xf32>
    %19 = arith.addf %16, %18 : vector<256x32xf32>
    %20 = arith.truncf %19 : vector<256x32xf32> to vector<256x32xbf16>
    %c0_19 = arith.constant 0 : index
    %c0_20 = arith.constant 0 : index
    %21 = vector.load %arg10[%c0_19, %c0_20] : memref<256x32xbf16, #tpu.memory_space<vmem>>, vector<256x32xbf16>
    tpu.vector_store %arg10[%c0_19, %c0_20], %20 {strides = array<i32>} : memref<256x32xbf16, #tpu.memory_space<vmem>>, vector<256x32xbf16>,
    return
  }
  func.func @transform_0(%arg0: i32) -> (i32, i32) {
    %c0_i32 = arith.constant 0 : i32
    %c0_i32_0 = arith.constant 0 : i32
    return %arg0, %c0_i32 : i32, i32
  }
  func.func @transform_1(%arg0: i32) -> (i32, i32) {
    %c0_i32 = arith.constant 0 : i32
    %c0_i32_0 = arith.constant 0 : i32
    %c0_i32_1 = arith.constant 0 : i32
    return %c0_i32, %c0_i32_0 : i32, i32
  }
  func.func @transform_2(%arg0: i32) -> (i32, i32) {
    %c0_i32 = arith.constant 0 : i32
    %c0_i32_0 = arith.constant 0 : i32
    %c0_i32_1 = arith.constant 0 : i32
    return %c0_i32, %c0_i32_0 : i32, i32
  }
  func.func @transform_3(%arg0: i32) -> (i32, i32) {
    %c0_i32 = arith.constant 0 : i32
    %c0_i32_0 = arith.constant 0 : i32
    %c0_i32_1 = arith.constant 0 : i32
    return %c0_i32, %c0_i32_0 : i32, i32
  }
  func.func @transform_4(%arg0: i32) -> (i32, i32) {
    %c0_i32 = arith.constant 0 : i32
    %c0_i32_0 = arith.constant 0 : i32
    %c0_i32_1 = arith.constant 0 : i32
    return %c0_i32, %c0_i32_0 : i32, i32
  }
  func.func @transform_5(%arg0: i32) -> (i32, i32) {
    %c0_i32 = arith.constant 0 : i32
    %c0_i32_0 = arith.constant 0 : i32
    %c0_i32_1 = arith.constant 0 : i32
    return %c0_i32, %c0_i32_0 : i32, i32
  }
  func.func @transform_6(%arg0: i32) -> (i32, i32) {
    %c0_i32 = arith.constant 0 : i32
    %c0_i32_0 = arith.constant 0 : i32
    %c0_i32_1 = arith.constant 0 : i32
    return %c0_i32, %c0_i32_0 : i32, i32
  }
  func.func @transform_7(%arg0: i32) -> (i32, i32) {
    %c0_i32 = arith.constant 0 : i32
    %c0_i32_0 = arith.constant 0 : i32
    return %arg0, %c0_i32 : i32, i32
  }
  func.func @transform_8(%arg0: i32) -> (i32, i32) {
    %c0_i32 = arith.constant 0 : i32
    %c0_i32_0 = arith.constant 0 : i32
    return %arg0, %c0_i32 : i32, i32
  }
  func.func @transform_9(%arg0: i32) -> (i32, i32) {
    %c0_i32 = arith.constant 0 : i32
    %c0_i32_0 = arith.constant 0 : i32
    return %arg0, %c0_i32 : i32, i32
  }
}

</mosaic_0001>

<bundles_post_ra>
// kernel: tpu_custom_call.1
= control target key start
LH: loop header
LB: loop body
LE: loop exit
PB: predicated region body
PF: predicated region fallthrough
CT: control target
= control target key end

     0   :  { %vm162_vm0 = vcmask 261120   ;;  %vm332_vm1 = vcmask 257024   ;;  %s1569_s1 = inlined_call_operand.vmem [shape: bf16[32,32], index: 1, kind: input, shape index: {}]   ;;  %s1570_s2 = inlined_call_operand.vmem [shape: bf16[32,32], index: 2, kind: input, shape index: {}]   ;;  %s1571_s3 = inlined_call_operand.vmem [shape: bf16[32,32], index: 3, kind: input, shape index: {}]   ;;  %s1572_s0 = inlined_call_operand.vmem [shape: bf16[256,32], index: 0, kind: input, shape index: {}]   ;;  %s1573_s4 = inlined_call_operand.vmem [shape: f32[1,32], index: 4, kind: input, shape index: {}]   ;;  %s1574_s5 = inlined_call_operand.vmem [shape: f32[1,32], index: 5, kind: input, shape index: {}]   ;;  %s1575_s6 = inlined_call_operand.vmem [shape: f32[1,32], index: 6, kind: input, shape index: {}]   ;;  %s1576_s7 = inlined_call_operand.vmem [shape: bf16[256,32], index: 7, kind: output, shape index: {0}]   ;;  %s1577_s8 = inlined_call_operand.vmem [shape: bf16[256,32], index: 8, kind: output, shape index: {1}]   ;;  %s1578_s9 = inlined_call_operand.vmem [shape: bf16[256,32], index: 9, kind: output, shape index: {2}]  }
   0x1   :  { %v876_v0 = vld [vmem:[%s1569_s1 + $0x8] sm:$0xff]  ;;  %v875_v3 = vld [vmem:[%s1569_s1] sm:$0xff]  ;;  %v861_v10 = vld [vmem:[%s1572_s0 + $0x10] sm:$0xff] }
   0x2   :  { %v878_v1 = vld [vmem:[%s1570_s2 + $0x8] sm:$0xff]  ;;  %217 = vmatpush.bf16.msra.mxu0 %v876_v0  ;;  %881 = vmatpush.bf16.msra.mxu3 %v876_v0  ;;  %v877_v4 = vld [vmem:[%s1570_s2] sm:$0xff]  ;;  %v990_v11 = vld [vmem:[%s1572_s0 + $0x70] sm:$0xff] }
   0x3   :  { %v880_v2 = vld [vmem:[%s1571_s3 + $0x8] sm:$0xff]  ;;  %391 = vmatpush.bf16.msra.mxu1 %v878_v1  ;;  %v879_v5 = vld [vmem:[%s1571_s3] sm:$0xff]  ;;  %v862_v12 = vld [vmem:[%s1572_s0 + $0x18] sm:$0xff] }
   0x4   :  { %564 = vmatpush.bf16.msra.mxu2 %v880_v2  ;;  %v859_v6 = vld [vmem:[%s1572_s0] sm:$0xff]  ;;  %v860_v8 = vld [vmem:[%s1572_s0 + $0x8] sm:$0xff]  ;;  %v1003_v13 = vld [vmem:[%s1572_s0 + $0x78] sm:$0xff] }
   0x5   :  { %v964_v7 = vld [vmem:[%s1572_s0 + $0x60] sm:$0xff]  ;;  %v977_v9 = vld [vmem:[%s1572_s0 + $0x68] sm:$0xff]  ;;  %v865_v16 = vld [vmem:[%s1572_s0 + $0x30] sm:$0xff] }
   0x6   :  { %218 = vmatpush.bf16.msra.mxu0 %v875_v3  ;;  %882 = vmatpush.bf16.msra.mxu3 %v875_v3  ;;  %v863_v14 = vld [vmem:[%s1572_s0 + $0x20] sm:$0xff]  ;;  %v864_v15 = vld [vmem:[%s1572_s0 + $0x28] sm:$0xff]  ;;  %v866_v17 = vld [vmem:[%s1572_s0 + $0x38] sm:$0xff] }
   0x7   :  { %392 = vmatpush.bf16.msra.mxu1 %v877_v4  ;;  %v1045_v18 = vld [vmem:[%s1573_s4] ss:$0 sm:$0xff]  ;;  %v868_v43 = vld [vmem:[%s1572_s0 + $0x48] sm:$0xff] }
   0x8   :  { %565 = vmatpush.bf16.msra.mxu2 %v879_v5  ;;  %v1050_v19 = vld [vmem:[%s1574_s5] ss:$0 sm:$0xff] }
   0x9   :  { %795 = vmatmul.msk.bf16.vlgmr.msra.gmra.mxu0 %vm162_vm0, %v859_v6  ;;  %807 = vmatmul.msk.bf16.vlgmr.msra.gmra.mxu3 %vm162_vm0, %v964_v7  ;;  %v867_v20 = vld [vmem:[%s1572_s0 + $0x40] sm:$0xff] }
   0xa   :  { %883 = vmatpush.bf16.msrb.mxu3 %v878_v1  ;;  %819 = vmatmul.msk.bf16.vlgmr.msra.gmra.mxu1 %vm162_vm0, %v859_v6  ;;  %v1065_v27 = vld [vmem:[%s1575_s6] ss:$0 sm:$0xff] }
   0xb   :  { %843 = vmatmul.msk.bf16.vlgmr.msra.gmra.mxu2 %vm162_vm0, %v859_v6 }
   0xe   :  { %884 = vmatpush.bf16.msrb.mxu3 %v877_v4  ;;  %v869_v4 = vld [vmem:[%s1572_s0 + $0x50] sm:$0xff] }
  0x12   :  { %885 = vmatpush.bf16.msra.mxu3 %v880_v2 }
  0x16   :  { %886 = vmatpush.bf16.msra.mxu3 %v879_v5 }
  0x19   :  { %796 = vmatmul.msk.bf16.gmra.mxu0 %vm162_vm0, %v860_v8  ;;  %808 = vmatmul.msk.bf16.gmra.mxu3 %vm162_vm0, %v977_v9 }
  0x1a   :  { %820 = vmatmul.msk.bf16.gmra.mxu1 %vm162_vm0, %v860_v8 }
  0x1b   :  { %844 = vmatmul.msk.bf16.gmra.mxu2 %vm162_vm0, %v860_v8 }
  0x29   :  { %797 = vmatmul.msk.bf16.gmra.mxu0 %vm162_vm0, %v861_v10  ;;  %809 = vmatmul.msk.bf16.gmra.mxu3 %vm162_vm0, %v990_v11 }
  0x2a   :  { %821 = vmatmul.msk.bf16.gmra.mxu1 %vm162_vm0, %v861_v10 }
  0x2b   :  { %845 = vmatmul.msk.bf16.gmra.mxu2 %vm162_vm0, %v861_v10 }
  0x39   :  { %798 = vmatmul.msk.bf16.gmra.mxu0 %vm162_vm0, %v862_v12  ;;  %810 = vmatmul.msk.bf16.gmra.mxu3 %vm162_vm0, %v1003_v13 }
  0x3a   :  { %822 = vmatmul.msk.bf16.gmra.mxu1 %vm162_vm0, %v862_v12 }
  0x3b   :  { %846 = vmatmul.msk.bf16.gmra.mxu2 %vm162_vm0, %v862_v12 }
  0x49   :  { %799 = vmatmul.msk.bf16.gmra.mxu0 %vm162_vm0, %v863_v14  ;;  %831 = vmatmul.msk.bf16.vlgmr.msrb.gmra.mxu3 %vm162_vm0, %v964_v7 }
  0x4a   :  { %823 = vmatmul.msk.bf16.gmra.mxu1 %vm162_vm0, %v863_v14 }
  0x4b   :  { %847 = vmatmul.msk.bf16.gmra.mxu2 %vm162_vm0, %v863_v14 }
  0x59   :  { %800 = vmatmul.msk.bf16.gmra.mxu0 %vm162_vm0, %v864_v15  ;;  %832 = vmatmul.msk.bf16.gmra.mxu3 %vm162_vm0, %v977_v9 }
  0x5a   :  { %824 = vmatmul.msk.bf16.gmra.mxu1 %vm162_vm0, %v864_v15 }
  0x5b   :  { %848 = vmatmul.msk.bf16.gmra.mxu2 %vm162_vm0, %v864_v15 }
  0x69   :  { %801 = vmatmul.msk.bf16.gmra.mxu0 %vm162_vm0, %v865_v16  ;;  %833 = vmatmul.msk.bf16.gmra.mxu3 %vm162_vm0, %v990_v11 }
  0x6a   :  { %825 = vmatmul.msk.bf16.gmra.mxu1 %vm162_vm0, %v865_v16 }
  0x6b   :  { %849 = vmatmul.msk.bf16.gmra.mxu2 %vm162_vm0, %v865_v16 }
  0x79   :  { %802 = vmatmul.msk.bf16.gmra.mxu0 %vm162_vm0, %v866_v17  ;;  %834 = vmatmul.msk.bf16.gmra.mxu3 %vm162_vm0, %v1003_v13 }
  0x7a   :  { %826 = vmatmul.msk.bf16.gmra.mxu1 %vm162_vm0, %v866_v17 }
  0x7b   :  { %850 = vmatmul.msk.bf16.gmra.mxu2 %vm162_vm0, %v866_v17 }
  0x86   :  { %v220_v21 = vpop.f32.mrf.mxu0 }
  0x87   :  { %v221_v22 = vadd.f32 %v1045_v18, %v220_v21  ;;  %v394_v23 = vpop.f32.mrf.mxu1 }
  0x88   :  { %v395_v24 = vadd.f32 %v1050_v19, %v394_v23 }
  0x89   :  { %v300_v25 = vpack.c.bf16 %v221_v22, %v221_v22  ;;  %803 = vmatmul.msk.bf16.gmra.mxu0 %vm162_vm0, %v867_v20  ;;  %855 = vmatmul.msk.bf16.vlgmr.msra.gmra.mxu3 %vm162_vm0, %v964_v7 }
  0x8a   :  { %v474_v26 = vpack.c.bf16 %v395_v24, %v395_v24  ;;  %827 = vmatmul.msk.bf16.gmra.mxu1 %vm162_vm0, %v867_v20 }
  0x8b   :  { %851 = vmatmul.msk.bf16.gmra.mxu2 %vm162_vm0, %v867_v20  ;;  %333 = vst.msk [vmem:[%s1576_s7] sm:$0xf] %vm332_vm1, %v300_v25 }
  0x8c   :  { %506 = vst.msk [vmem:[%s1577_s8] sm:$0xf] %vm332_vm1, %v474_v26  ;;  %v280_v28 = vpop.f32.mrf.mxu3 }
  0x8d   :  { %v281_v29 = vadd.f32 %v1045_v18, %v280_v28 }
  0x8e   :  { %v567_v30 = vpop.f32.mrf.mxu2  ;;  %v222_v32 = vpop.f32.mrf.mxu0 }
  0x8f   :  { %v568_v31 = vadd.f32 %v1065_v27, %v567_v30  ;;  %v324_v33 = vpack.c.bf16 %v281_v29, %v281_v29  ;;  %v223_v34 = vadd.f32 %v1045_v18, %v222_v32  ;;  %v396_v35 = vpop.f32.mrf.mxu1 }
  0x90   :  { %v397_v37 = vadd.f32 %v1050_v19, %v396_v35 }
  0x91   :  { %v647_v36 = vpack.c.bf16 %v568_v31, %v568_v31  ;;  %357 = vst.msk [vmem:[%s1576_s7 + $0x60] sm:$0xf] %vm332_vm1, %v324_v33  ;;  %v301_v38 = vpack.c.bf16 %v223_v34, %v223_v34  ;;  %v870_v33 = vld [vmem:[%s1572_s0 + $0x58] sm:$0xff] }
  0x92   :  { %v475_v39 = vpack.c.bf16 %v397_v37, %v397_v37 }
  0x93   :  { %679 = vst.msk [vmem:[%s1578_s9] sm:$0xf] %vm332_vm1, %v647_v36 }
  0x94   :  { %334 = vst.msk [vmem:[%s1576_s7 + $0x4] sm:$0xf] %vm332_vm1, %v301_v38  ;;  %v282_v40 = vpop.f32.mrf.mxu3 }
  0x95   :  { %507 = vst.msk [vmem:[%s1577_s8 + $0x4] sm:$0xf] %vm332_vm1, %v475_v39  ;;  %v283_v41 = vadd.f32 %v1045_v18, %v282_v40 }
  0x96   :  { %v569_v42 = vpop.f32.mrf.mxu2  ;;  %v225_v45 = vpop.f32.mrf.mxu0 }
  0x97   :  { %v570_v44 = vadd.f32 %v1065_v27, %v569_v42  ;;  %v325_v46 = vpack.c.bf16 %v283_v41, %v283_v41  ;;  %v226_v47 = vadd.f32 %v1045_v18, %v225_v45  ;;  %v399_v48 = vpop.f32.mrf.mxu1 }
  0x98   :  { %v400_v50 = vadd.f32 %v1050_v19, %v399_v48 }
  0x99   :  { %v648_v49 = vpack.c.bf16 %v570_v44, %v570_v44  ;;  %358 = vst.msk [vmem:[%s1576_s7 + $0x64] sm:$0xf] %vm332_vm1, %v325_v46  ;;  %v302_v51 = vpack.c.bf16 %v226_v47, %v226_v47  ;;  %804 = vmatmul.msk.bf16.gmra.mxu0 %vm162_vm0, %v868_v43  ;;  %856 = vmatmul.msk.bf16.gmra.mxu3 %vm162_vm0, %v977_v9 }
  0x9a   :  { %v476_v52 = vpack.c.bf16 %v400_v50, %v400_v50  ;;  %828 = vmatmul.msk.bf16.gmra.mxu1 %vm162_vm0, %v868_v43 }
  0x9b   :  { %680 = vst.msk [vmem:[%s1578_s9 + $0x4] sm:$0xf] %vm332_vm1, %v648_v49  ;;  %852 = vmatmul.msk.bf16.gmra.mxu2 %vm162_vm0, %v868_v43 }
  0x9c   :  { %335 = vst.msk [vmem:[%s1576_s7 + $0x8] sm:$0xf] %vm332_vm1, %v302_v51  ;;  %v285_v53 = vpop.f32.mrf.mxu3 }
  0x9d   :  { %508 = vst.msk [vmem:[%s1577_s8 + $0x8] sm:$0xf] %vm332_vm1, %v476_v52  ;;  %v286_v54 = vadd.f32 %v1045_v18, %v285_v53 }
  0x9e   :  { %v572_v55 = vpop.f32.mrf.mxu2  ;;  %v227_v57 = vpop.f32.mrf.mxu0 }
  0x9f   :  { %v573_v56 = vadd.f32 %v1065_v27, %v572_v55  ;;  %v326_v58 = vpack.c.bf16 %v286_v54, %v286_v54  ;;  %v228_v59 = vadd.f32 %v1045_v18, %v227_v57  ;;  %v401_v60 = vpop.f32.mrf.mxu1 }
  0xa0   :  { %v402_v62 = vadd.f32 %v1050_v19, %v401_v60 }
  0xa1   :  { %v649_v61 = vpack.c.bf16 %v573_v56, %v573_v56  ;;  %359 = vst.msk [vmem:[%s1576_s7 + $0x68] sm:$0xf] %vm332_vm1, %v326_v58  ;;  %v303_v63 = vpack.c.bf16 %v228_v59, %v228_v59 }
  0xa2   :  { %v477_v0 = vpack.c.bf16 %v402_v62, %v402_v62 }
  0xa3   :  { %681 = vst.msk [vmem:[%s1578_s9 + $0x8] sm:$0xf] %vm332_vm1, %v649_v61 }
  0xa4   :  { %336 = vst.msk [vmem:[%s1576_s7 + $0xc] sm:$0xf] %vm332_vm1, %v303_v63  ;;  %v287_v1 = vpop.f32.mrf.mxu3 }
  0xa5   :  { %509 = vst.msk [vmem:[%s1577_s8 + $0xc] sm:$0xf] %vm332_vm1, %v477_v0  ;;  %v288_v2 = vadd.f32 %v1045_v18, %v287_v1 }
  0xa6   :  { %v574_v3 = vpop.f32.mrf.mxu2  ;;  %v230_v6 = vpop.f32.mrf.mxu0 }
  0xa7   :  { %v575_v5 = vadd.f32 %v1065_v27, %v574_v3  ;;  %v327_v7 = vpack.c.bf16 %v288_v2, %v288_v2  ;;  %v231_v8 = vadd.f32 %v1045_v18, %v230_v6  ;;  %v404_v9 = vpop.f32.mrf.mxu1 }
  0xa8   :  { %v405_v12 = vadd.f32 %v1050_v19, %v404_v9 }
  0xa9   :  { %v650_v10 = vpack.c.bf16 %v575_v5, %v575_v5  ;;  %360 = vst.msk [vmem:[%s1576_s7 + $0x6c] sm:$0xf] %vm332_vm1, %v327_v7  ;;  %v304_v14 = vpack.c.bf16 %v231_v8, %v231_v8  ;;  %805 = vmatmul.msk.bf16.gmra.mxu0 %vm162_vm0, %v869_v4  ;;  %857 = vmatmul.msk.bf16.gmra.mxu3 %vm162_vm0, %v990_v11 }
  0xaa   :  { %v478_v15 = vpack.c.bf16 %v405_v12, %v405_v12  ;;  %829 = vmatmul.msk.bf16.gmra.mxu1 %vm162_vm0, %v869_v4 }
  0xab   :  { %682 = vst.msk [vmem:[%s1578_s9 + $0xc] sm:$0xf] %vm332_vm1, %v650_v10  ;;  %853 = vmatmul.msk.bf16.gmra.mxu2 %vm162_vm0, %v869_v4 }
  0xac   :  { %337 = vst.msk [vmem:[%s1576_s7 + $0x10] sm:$0xf] %vm332_vm1, %v304_v14  ;;  %v290_v11 = vpop.f32.mrf.mxu3 }
  0xad   :  { %510 = vst.msk [vmem:[%s1577_s8 + $0x10] sm:$0xf] %vm332_vm1, %v478_v15  ;;  %v291_v16 = vadd.f32 %v1045_v18, %v290_v11 }
  0xae   :  { %v577_v17 = vpop.f32.mrf.mxu2  ;;  %v232_v21 = vpop.f32.mrf.mxu0 }
  0xaf   :  { %v578_v20 = vadd.f32 %v1065_v27, %v577_v17  ;;  %v328_v22 = vpack.c.bf16 %v291_v16, %v291_v16  ;;  %v233_v23 = vadd.f32 %v1045_v18, %v232_v21  ;;  %v406_v24 = vpop.f32.mrf.mxu1 }
  0xb0   :  { %v407_v26 = vadd.f32 %v1050_v19, %v406_v24 }
  0xb1   :  { %v651_v25 = vpack.c.bf16 %v578_v20, %v578_v20  ;;  %361 = vst.msk [vmem:[%s1576_s7 + $0x70] sm:$0xf] %vm332_vm1, %v328_v22  ;;  %v305_v28 = vpack.c.bf16 %v233_v23, %v233_v23 }
  0xb2   :  { %v479_v29 = vpack.c.bf16 %v407_v26, %v407_v26 }
  0xb3   :  { %683 = vst.msk [vmem:[%s1578_s9 + $0x10] sm:$0xf] %vm332_vm1, %v651_v25 }
  0xb4   :  { %338 = vst.msk [vmem:[%s1576_s7 + $0x14] sm:$0xf] %vm332_vm1, %v305_v28  ;;  %v292_v30 = vpop.f32.mrf.mxu3 }
  0xb5   :  { %511 = vst.msk [vmem:[%s1577_s8 + $0x14] sm:$0xf] %vm332_vm1, %v479_v29  ;;  %v293_v31 = vadd.f32 %v1045_v18, %v292_v30 }
  0xb6   :  { %v579_v32 = vpop.f32.mrf.mxu2  ;;  %v235_v35 = vpop.f32.mrf.mxu0 }
  0xb7   :  { %v580_v34 = vadd.f32 %v1065_v27, %v579_v32  ;;  %v329_v36 = vpack.c.bf16 %v293_v31, %v293_v31  ;;  %v236_v37 = vadd.f32 %v1045_v18, %v235_v35  ;;  %v409_v38 = vpop.f32.mrf.mxu1 }
  0xb8   :  { %v410_v40 = vadd.f32 %v1050_v19, %v409_v38 }
  0xb9   :  { %v652_v39 = vpack.c.bf16 %v580_v34, %v580_v34  ;;  %362 = vst.msk [vmem:[%s1576_s7 + $0x74] sm:$0xf] %vm332_vm1, %v329_v36  ;;  %v306_v41 = vpack.c.bf16 %v236_v37, %v236_v37  ;;  %806 = vmatmul.msk.bf16.gmra.mxu0 %vm162_vm0, %v870_v33  ;;  %858 = vmatmul.msk.bf16.gmra.mxu3 %vm162_vm0, %v1003_v13 }
  0xba   :  { %v480_v42 = vpack.c.bf16 %v410_v40, %v410_v40  ;;  %830 = vmatmul.msk.bf16.gmra.mxu1 %vm162_vm0, %v870_v33 }
  0xbb   :  { %684 = vst.msk [vmem:[%s1578_s9 + $0x14] sm:$0xf] %vm332_vm1, %v652_v39  ;;  %854 = vmatmul.msk.bf16.gmra.mxu2 %vm162_vm0, %v870_v33 }
  0xbc   :  { %339 = vst.msk [vmem:[%s1576_s7 + $0x18] sm:$0xf] %vm332_vm1, %v306_v41  ;;  %v295_v13 = vpop.f32.mrf.mxu3 }
  0xbd   :  { %512 = vst.msk [vmem:[%s1577_s8 + $0x18] sm:$0xf] %vm332_vm1, %v480_v42  ;;  %v296_v43 = vadd.f32 %v1045_v18, %v295_v13 }
  0xbe   :  { %v582_v44 = vpop.f32.mrf.mxu2  ;;  %v237_v46 = vpop.f32.mrf.mxu0 }
  0xbf   :  { %v583_v45 = vadd.f32 %v1065_v27, %v582_v44  ;;  %v330_v47 = vpack.c.bf16 %v296_v43, %v296_v43  ;;  %v238_v48 = vadd.f32 %v1045_v18, %v237_v46  ;;  %v411_v49 = vpop.f32.mrf.mxu1 }
  0xc0   :  { %v412_v51 = vadd.f32 %v1050_v19, %v411_v49 }
  0xc1   :  { %v653_v50 = vpack.c.bf16 %v583_v45, %v583_v45  ;;  %363 = vst.msk [vmem:[%s1576_s7 + $0x78] sm:$0xf] %vm332_vm1, %v330_v47  ;;  %v307_v52 = vpack.c.bf16 %v238_v48, %v238_v48 }
  0xc2   :  { %v481_v53 = vpack.c.bf16 %v412_v51, %v412_v51 }
  0xc3   :  { %685 = vst.msk [vmem:[%s1578_s9 + $0x18] sm:$0xf] %vm332_vm1, %v653_v50 }
  0xc4   :  { %340 = vst.msk [vmem:[%s1576_s7 + $0x1c] sm:$0xf] %vm332_vm1, %v307_v52  ;;  %v297_v54 = vpop.f32.mrf.mxu3 }
  0xc5   :  { %513 = vst.msk [vmem:[%s1577_s8 + $0x1c] sm:$0xf] %vm332_vm1, %v481_v53  ;;  %v298_v55 = vadd.f32 %v1045_v18, %v297_v54 }
  0xc6   :  { %v584_v56 = vpop.f32.mrf.mxu2  ;;  %v240_v58 = vpop.f32.mrf.mxu0 }
  0xc7   :  { %v585_v57 = vadd.f32 %v1065_v27, %v584_v56  ;;  %v331_v59 = vpack.c.bf16 %v298_v55, %v298_v55  ;;  %v241_v60 = vadd.f32 %v1045_v18, %v240_v58  ;;  %v414_v61 = vpop.f32.mrf.mxu1 }
  0xc8   :  { %v415_v63 = vadd.f32 %v1050_v19, %v414_v61 }
  0xc9   :  { %v654_v62 = vpack.c.bf16 %v585_v57, %v585_v57  ;;  %364 = vst.msk [vmem:[%s1576_s7 + $0x7c] sm:$0xf] %vm332_vm1, %v331_v59  ;;  %v308_v0 = vpack.c.bf16 %v241_v60, %v241_v60 }
  0xca   :  { %v482_v1 = vpack.c.bf16 %v415_v63, %v415_v63 }
  0xcb   :  { %686 = vst.msk [vmem:[%s1578_s9 + $0x1c] sm:$0xf] %vm332_vm1, %v654_v62 }
  0xcc   :  { %341 = vst.msk [vmem:[%s1576_s7 + $0x20] sm:$0xf] %vm332_vm1, %v308_v0  ;;  %v454_v2 = vpop.f32.mrf.mxu3 }
  0xcd   :  { %514 = vst.msk [vmem:[%s1577_s8 + $0x20] sm:$0xf] %vm332_vm1, %v482_v1  ;;  %v455_v3 = vadd.f32 %v1050_v19, %v454_v2 }
  0xce   :  { %v587_v4 = vpop.f32.mrf.mxu2  ;;  %v242_v6 = vpop.f32.mrf.mxu0 }
  0xcf   :  { %v588_v5 = vadd.f32 %v1065_v27, %v587_v4  ;;  %v498_v7 = vpack.c.bf16 %v455_v3, %v455_v3  ;;  %v243_v8 = vadd.f32 %v1045_v18, %v242_v6  ;;  %v416_v9 = vpop.f32.mrf.mxu1 }
  0xd0   :  { %v417_v12 = vadd.f32 %v1050_v19, %v416_v9 }
  0xd1   :  { %v655_v10 = vpack.c.bf16 %v588_v5, %v588_v5  ;;  %530 = vst.msk [vmem:[%s1577_s8 + $0x60] sm:$0xf] %vm332_vm1, %v498_v7  ;;  %v309_v14 = vpack.c.bf16 %v243_v8, %v243_v8 }
  0xd2   :  { %v483_v15 = vpack.c.bf16 %v417_v12, %v417_v12 }
  0xd3   :  { %687 = vst.msk [vmem:[%s1578_s9 + $0x20] sm:$0xf] %vm332_vm1, %v655_v10 }
  0xd4   :  { %342 = vst.msk [vmem:[%s1576_s7 + $0x24] sm:$0xf] %vm332_vm1, %v309_v14  ;;  %v456_v11 = vpop.f32.mrf.mxu3 }
  0xd5   :  { %515 = vst.msk [vmem:[%s1577_s8 + $0x24] sm:$0xf] %vm332_vm1, %v483_v15  ;;  %v457_v16 = vadd.f32 %v1050_v19, %v456_v11 }
  0xd6   :  { %v589_v17 = vpop.f32.mrf.mxu2  ;;  %v245_v21 = vpop.f32.mrf.mxu0 }
  0xd7   :  { %v590_v20 = vadd.f32 %v1065_v27, %v589_v17  ;;  %v499_v22 = vpack.c.bf16 %v457_v16, %v457_v16  ;;  %v246_v23 = vadd.f32 %v1045_v18, %v245_v21  ;;  %v419_v24 = vpop.f32.mrf.mxu1 }
  0xd8   :  { %v420_v26 = vadd.f32 %v1050_v19, %v419_v24 }
  0xd9   :  { %v656_v25 = vpack.c.bf16 %v590_v20, %v590_v20  ;;  %531 = vst.msk [vmem:[%s1577_s8 + $0x64] sm:$0xf] %vm332_vm1, %v499_v22  ;;  %v310_v28 = vpack.c.bf16 %v246_v23, %v246_v23 }
  0xda   :  { %v484_v29 = vpack.c.bf16 %v420_v26, %v420_v26 }
  0xdb   :  { %688 = vst.msk [vmem:[%s1578_s9 + $0x24] sm:$0xf] %vm332_vm1, %v656_v25 }
  0xdc   :  { %343 = vst.msk [vmem:[%s1576_s7 + $0x28] sm:$0xf] %vm332_vm1, %v310_v28  ;;  %v459_v30 = vpop.f32.mrf.mxu3 }
  0xdd   :  { %516 = vst.msk [vmem:[%s1577_s8 + $0x28] sm:$0xf] %vm332_vm1, %v484_v29  ;;  %v460_v31 = vadd.f32 %v1050_v19, %v459_v30 }
  0xde   :  { %v592_v32 = vpop.f32.mrf.mxu2  ;;  %v247_v34 = vpop.f32.mrf.mxu0 }
  0xdf   :  { %v593_v33 = vadd.f32 %v1065_v27, %v592_v32  ;;  %v500_v35 = vpack.c.bf16 %v460_v31, %v460_v31  ;;  %v248_v36 = vadd.f32 %v1045_v18, %v247_v34  ;;  %v421_v37 = vpop.f32.mrf.mxu1 }
  0xe0   :  { %v422_v39 = vadd.f32 %v1050_v19, %v421_v37 }
  0xe1   :  { %v657_v38 = vpack.c.bf16 %v593_v33, %v593_v33  ;;  %532 = vst.msk [vmem:[%s1577_s8 + $0x68] sm:$0xf] %vm332_vm1, %v500_v35  ;;  %v311_v40 = vpack.c.bf16 %v248_v36, %v248_v36 }
  0xe2   :  { %v485_v41 = vpack.c.bf16 %v422_v39, %v422_v39 }
  0xe3   :  { %689 = vst.msk [vmem:[%s1578_s9 + $0x28] sm:$0xf] %vm332_vm1, %v657_v38 }
  0xe4   :  { %344 = vst.msk [vmem:[%s1576_s7 + $0x2c] sm:$0xf] %vm332_vm1, %v311_v40  ;;  %v461_v42 = vpop.f32.mrf.mxu3 }
  0xe5   :  { %517 = vst.msk [vmem:[%s1577_s8 + $0x2c] sm:$0xf] %vm332_vm1, %v485_v41  ;;  %v462_v13 = vadd.f32 %v1050_v19, %v461_v42 }
  0xe6   :  { %v594_v43 = vpop.f32.mrf.mxu2  ;;  %v250_v45 = vpop.f32.mrf.mxu0 }
  0xe7   :  { %v595_v44 = vadd.f32 %v1065_v27, %v594_v43  ;;  %v501_v46 = vpack.c.bf16 %v462_v13, %v462_v13  ;;  %v251_v47 = vadd.f32 %v1045_v18, %v250_v45  ;;  %v424_v48 = vpop.f32.mrf.mxu1 }
  0xe8   :  { %v425_v50 = vadd.f32 %v1050_v19, %v424_v48 }
  0xe9   :  { %v658_v49 = vpack.c.bf16 %v595_v44, %v595_v44  ;;  %533 = vst.msk [vmem:[%s1577_s8 + $0x6c] sm:$0xf] %vm332_vm1, %v501_v46  ;;  %v312_v51 = vpack.c.bf16 %v251_v47, %v251_v47 }
  0xea   :  { %v486_v52 = vpack.c.bf16 %v425_v50, %v425_v50 }
  0xeb   :  { %690 = vst.msk [vmem:[%s1578_s9 + $0x2c] sm:$0xf] %vm332_vm1, %v658_v49 }
  0xec   :  { %345 = vst.msk [vmem:[%s1576_s7 + $0x30] sm:$0xf] %vm332_vm1, %v312_v51  ;;  %v464_v53 = vpop.f32.mrf.mxu3 }
  0xed   :  { %518 = vst.msk [vmem:[%s1577_s8 + $0x30] sm:$0xf] %vm332_vm1, %v486_v52  ;;  %v465_v54 = vadd.f32 %v1050_v19, %v464_v53 }
  0xee   :  { %v597_v55 = vpop.f32.mrf.mxu2  ;;  %v252_v57 = vpop.f32.mrf.mxu0 }
  0xef   :  { %v598_v56 = vadd.f32 %v1065_v27, %v597_v55  ;;  %v502_v58 = vpack.c.bf16 %v465_v54, %v465_v54  ;;  %v253_v59 = vadd.f32 %v1045_v18, %v252_v57  ;;  %v426_v60 = vpop.f32.mrf.mxu1 }
  0xf0   :  { %v427_v62 = vadd.f32 %v1050_v19, %v426_v60 }
  0xf1   :  { %v659_v61 = vpack.c.bf16 %v598_v56, %v598_v56  ;;  %534 = vst.msk [vmem:[%s1577_s8 + $0x70] sm:$0xf] %vm332_vm1, %v502_v58  ;;  %v313_v63 = vpack.c.bf16 %v253_v59, %v253_v59 }
  0xf2   :  { %v487_v0 = vpack.c.bf16 %v427_v62, %v427_v62 }
  0xf3   :  { %691 = vst.msk [vmem:[%s1578_s9 + $0x30] sm:$0xf] %vm332_vm1, %v659_v61 }
  0xf4   :  { %346 = vst.msk [vmem:[%s1576_s7 + $0x34] sm:$0xf] %vm332_vm1, %v313_v63  ;;  %v466_v1 = vpop.f32.mrf.mxu3 }
  0xf5   :  { %519 = vst.msk [vmem:[%s1577_s8 + $0x34] sm:$0xf] %vm332_vm1, %v487_v0  ;;  %v467_v2 = vadd.f32 %v1050_v19, %v466_v1 }
  0xf6   :  { %v599_v3 = vpop.f32.mrf.mxu2  ;;  %v255_v5 = vpop.f32.mrf.mxu0 }
  0xf7   :  { %v600_v4 = vadd.f32 %v1065_v27, %v599_v3  ;;  %v503_v6 = vpack.c.bf16 %v467_v2, %v467_v2  ;;  %v256_v7 = vadd.f32 %v1045_v18, %v255_v5  ;;  %v429_v8 = vpop.f32.mrf.mxu1 }
  0xf8   :  { %v430_v10 = vadd.f32 %v1050_v19, %v429_v8 }
  0xf9   :  { %v660_v9 = vpack.c.bf16 %v600_v4, %v600_v4  ;;  %535 = vst.msk [vmem:[%s1577_s8 + $0x74] sm:$0xf] %vm332_vm1, %v503_v6  ;;  %v314_v12 = vpack.c.bf16 %v256_v7, %v256_v7 }
  0xfa   :  { %v488_v14 = vpack.c.bf16 %v430_v10, %v430_v10 }
  0xfb   :  { %692 = vst.msk [vmem:[%s1578_s9 + $0x34] sm:$0xf] %vm332_vm1, %v660_v9 }
  0xfc   :  { %347 = vst.msk [vmem:[%s1576_s7 + $0x38] sm:$0xf] %vm332_vm1, %v314_v12  ;;  %v469_v15 = vpop.f32.mrf.mxu3 }
  0xfd   :  { %520 = vst.msk [vmem:[%s1577_s8 + $0x38] sm:$0xf] %vm332_vm1, %v488_v14  ;;  %v470_v11 = vadd.f32 %v1050_v19, %v469_v15 }
  0xfe   :  { %v602_v16 = vpop.f32.mrf.mxu2  ;;  %v257_v20 = vpop.f32.mrf.mxu0 }
  0xff   :  { %v603_v17 = vadd.f32 %v1065_v27, %v602_v16  ;;  %v504_v21 = vpack.c.bf16 %v470_v11, %v470_v11  ;;  %v258_v22 = vadd.f32 %v1045_v18, %v257_v20  ;;  %v431_v23 = vpop.f32.mrf.mxu1 }
 0x100   :  { %v432_v25 = vadd.f32 %v1050_v19, %v431_v23 }
 0x101   :  { %v661_v24 = vpack.c.bf16 %v603_v17, %v603_v17  ;;  %536 = vst.msk [vmem:[%s1577_s8 + $0x78] sm:$0xf] %vm332_vm1, %v504_v21  ;;  %v315_v26 = vpack.c.bf16 %v258_v22, %v258_v22 }
 0x102   :  { %v489_v28 = vpack.c.bf16 %v432_v25, %v432_v25 }
 0x103   :  { %693 = vst.msk [vmem:[%s1578_s9 + $0x38] sm:$0xf] %vm332_vm1, %v661_v24 }
 0x104   :  { %348 = vst.msk [vmem:[%s1576_s7 + $0x3c] sm:$0xf] %vm332_vm1, %v315_v26  ;;  %v471_v29 = vpop.f32.mrf.mxu3 }
 0x105   :  { %521 = vst.msk [vmem:[%s1577_s8 + $0x3c] sm:$0xf] %vm332_vm1, %v489_v28  ;;  %v472_v30 = vadd.f32 %v1050_v19, %v471_v29 }
 0x106   :  { %v604_v31 = vpop.f32.mrf.mxu2  ;;  %v260_v33 = vpop.f32.mrf.mxu0 }
 0x107   :  { %v605_v32 = vadd.f32 %v1065_v27, %v604_v31  ;;  %v505_v34 = vpack.c.bf16 %v472_v30, %v472_v30  ;;  %v261_v35 = vadd.f32 %v1045_v18, %v260_v33  ;;  %v434_v36 = vpop.f32.mrf.mxu1 }
 0x108   :  { %v435_v38 = vadd.f32 %v1050_v19, %v434_v36 }
 0x109   :  { %v662_v37 = vpack.c.bf16 %v605_v32, %v605_v32  ;;  %537 = vst.msk [vmem:[%s1577_s8 + $0x7c] sm:$0xf] %vm332_vm1, %v505_v34  ;;  %v316_v39 = vpack.c.bf16 %v261_v35, %v261_v35 }
 0x10a   :  { %v490_v40 = vpack.c.bf16 %v435_v38, %v435_v38 }
 0x10b   :  { %694 = vst.msk [vmem:[%s1578_s9 + $0x3c] sm:$0xf] %vm332_vm1, %v662_v37 }
 0x10c   :  { %349 = vst.msk [vmem:[%s1576_s7 + $0x40] sm:$0xf] %vm332_vm1, %v316_v39  ;;  %v627_v41 = vpop.f32.mrf.mxu3 }
 0x10d   :  { %522 = vst.msk [vmem:[%s1577_s8 + $0x40] sm:$0xf] %vm332_vm1, %v490_v40  ;;  %v628_v13 = vadd.f32 %v1065_v27, %v627_v41 }
 0x10e   :  { %v607_v42 = vpop.f32.mrf.mxu2  ;;  %v262_v44 = vpop.f32.mrf.mxu0 }
 0x10f   :  { %v608_v43 = vadd.f32 %v1065_v27, %v607_v42  ;;  %v671_v45 = vpack.c.bf16 %v628_v13, %v628_v13  ;;  %v263_v46 = vadd.f32 %v1045_v18, %v262_v44  ;;  %v436_v47 = vpop.f32.mrf.mxu1 }
 0x110   :  { %v437_v49 = vadd.f32 %v1050_v19, %v436_v47 }
 0x111   :  { %v663_v48 = vpack.c.bf16 %v608_v43, %v608_v43  ;;  %703 = vst.msk [vmem:[%s1578_s9 + $0x60] sm:$0xf] %vm332_vm1, %v671_v45  ;;  %v317_v50 = vpack.c.bf16 %v263_v46, %v263_v46 }
 0x112   :  { %v491_v51 = vpack.c.bf16 %v437_v49, %v437_v49 }
 0x113   :  { %695 = vst.msk [vmem:[%s1578_s9 + $0x40] sm:$0xf] %vm332_vm1, %v663_v48 }
 0x114   :  { %350 = vst.msk [vmem:[%s1576_s7 + $0x44] sm:$0xf] %vm332_vm1, %v317_v50  ;;  %v629_v52 = vpop.f32.mrf.mxu3 }
 0x115   :  { %523 = vst.msk [vmem:[%s1577_s8 + $0x44] sm:$0xf] %vm332_vm1, %v491_v51  ;;  %v630_v54 = vadd.f32 %v1065_v27, %v629_v52 }
 0x116   :  { %v609_v53 = vpop.f32.mrf.mxu2  ;;  %v265_v56 = vpop.f32.mrf.mxu0 }
 0x117   :  { %v610_v55 = vadd.f32 %v1065_v27, %v609_v53  ;;  %v672_v57 = vpack.c.bf16 %v630_v54, %v630_v54  ;;  %v266_v58 = vadd.f32 %v1045_v18, %v265_v56  ;;  %v439_v59 = vpop.f32.mrf.mxu1 }
 0x118   :  { %v440_v61 = vadd.f32 %v1050_v19, %v439_v59 }
 0x119   :  { %v664_v60 = vpack.c.bf16 %v610_v55, %v610_v55  ;;  %704 = vst.msk [vmem:[%s1578_s9 + $0x64] sm:$0xf] %vm332_vm1, %v672_v57  ;;  %v318_v62 = vpack.c.bf16 %v266_v58, %v266_v58 }
 0x11a   :  { %v492_v63 = vpack.c.bf16 %v440_v61, %v440_v61 }
 0x11b   :  { %696 = vst.msk [vmem:[%s1578_s9 + $0x44] sm:$0xf] %vm332_vm1, %v664_v60 }
 0x11c   :  { %351 = vst.msk [vmem:[%s1576_s7 + $0x48] sm:$0xf] %vm332_vm1, %v318_v62  ;;  %v632_v0 = vpop.f32.mrf.mxu3 }
 0x11d   :  { %524 = vst.msk [vmem:[%s1577_s8 + $0x48] sm:$0xf] %vm332_vm1, %v492_v63  ;;  %v633_v2 = vadd.f32 %v1065_v27, %v632_v0 }
 0x11e   :  { %v612_v1 = vpop.f32.mrf.mxu2  ;;  %v267_v4 = vpop.f32.mrf.mxu0 }
 0x11f   :  { %v613_v3 = vadd.f32 %v1065_v27, %v612_v1  ;;  %v673_v5 = vpack.c.bf16 %v633_v2, %v633_v2  ;;  %v268_v6 = vadd.f32 %v1045_v18, %v267_v4  ;;  %v441_v7 = vpop.f32.mrf.mxu1 }
 0x120   :  { %v442_v9 = vadd.f32 %v1050_v19, %v441_v7 }
 0x121   :  { %v665_v8 = vpack.c.bf16 %v613_v3, %v613_v3  ;;  %705 = vst.msk [vmem:[%s1578_s9 + $0x68] sm:$0xf] %vm332_vm1, %v673_v5  ;;  %v319_v10 = vpack.c.bf16 %v268_v6, %v268_v6 }
 0x122   :  { %v493_v12 = vpack.c.bf16 %v442_v9, %v442_v9 }
 0x123   :  { %697 = vst.msk [vmem:[%s1578_s9 + $0x48] sm:$0xf] %vm332_vm1, %v665_v8 }
 0x124   :  { %352 = vst.msk [vmem:[%s1576_s7 + $0x4c] sm:$0xf] %vm332_vm1, %v319_v10  ;;  %v634_v14 = vpop.f32.mrf.mxu3 }
 0x125   :  { %525 = vst.msk [vmem:[%s1577_s8 + $0x4c] sm:$0xf] %vm332_vm1, %v493_v12  ;;  %v635_v11 = vadd.f32 %v1065_v27, %v634_v14 }
 0x126   :  { %v614_v15 = vpop.f32.mrf.mxu2  ;;  %v270_v17 = vpop.f32.mrf.mxu0 }
 0x127   :  { %v615_v16 = vadd.f32 %v1065_v27, %v614_v15  ;;  %v674_v20 = vpack.c.bf16 %v635_v11, %v635_v11  ;;  %v271_v21 = vadd.f32 %v1045_v18, %v270_v17  ;;  %v444_v22 = vpop.f32.mrf.mxu1 }
 0x128   :  { %v445_v24 = vadd.f32 %v1050_v19, %v444_v22 }
 0x129   :  { %v666_v23 = vpack.c.bf16 %v615_v16, %v615_v16  ;;  %706 = vst.msk [vmem:[%s1578_s9 + $0x6c] sm:$0xf] %vm332_vm1, %v674_v20  ;;  %v320_v25 = vpack.c.bf16 %v271_v21, %v271_v21 }
 0x12a   :  { %v494_v26 = vpack.c.bf16 %v445_v24, %v445_v24 }
 0x12b   :  { %698 = vst.msk [vmem:[%s1578_s9 + $0x4c] sm:$0xf] %vm332_vm1, %v666_v23 }
 0x12c   :  { %353 = vst.msk [vmem:[%s1576_s7 + $0x50] sm:$0xf] %vm332_vm1, %v320_v25  ;;  %v637_v28 = vpop.f32.mrf.mxu3 }
 0x12d   :  { %526 = vst.msk [vmem:[%s1577_s8 + $0x50] sm:$0xf] %vm332_vm1, %v494_v26  ;;  %v638_v30 = vadd.f32 %v1065_v27, %v637_v28 }
 0x12e   :  { %v617_v29 = vpop.f32.mrf.mxu2  ;;  %v272_v32 = vpop.f32.mrf.mxu0 }
 0x12f   :  { %v618_v31 = vadd.f32 %v1065_v27, %v617_v29  ;;  %v675_v33 = vpack.c.bf16 %v638_v30, %v638_v30  ;;  %v273_v34 = vadd.f32 %v1045_v18, %v272_v32  ;;  %v446_v35 = vpop.f32.mrf.mxu1 }
 0x130   :  { %v447_v37 = vadd.f32 %v1050_v19, %v446_v35 }
 0x131   :  { %v667_v36 = vpack.c.bf16 %v618_v31, %v618_v31  ;;  %707 = vst.msk [vmem:[%s1578_s9 + $0x70] sm:$0xf] %vm332_vm1, %v675_v33  ;;  %v321_v38 = vpack.c.bf16 %v273_v34, %v273_v34 }
 0x132   :  { %v495_v39 = vpack.c.bf16 %v447_v37, %v447_v37 }
 0x133   :  { %699 = vst.msk [vmem:[%s1578_s9 + $0x50] sm:$0xf] %vm332_vm1, %v667_v36 }
 0x134   :  { %354 = vst.msk [vmem:[%s1576_s7 + $0x54] sm:$0xf] %vm332_vm1, %v321_v38  ;;  %v639_v40 = vpop.f32.mrf.mxu3 }
 0x135   :  { %527 = vst.msk [vmem:[%s1577_s8 + $0x54] sm:$0xf] %vm332_vm1, %v495_v39  ;;  %v640_v42 = vadd.f32 %v1065_v27, %v639_v40 }
 0x136   :  { %v619_v41 = vpop.f32.mrf.mxu2  ;;  %v275_v43 = vpop.f32.mrf.mxu0 }
 0x137   :  { %v620_v13 = vadd.f32 %v1065_v27, %v619_v41  ;;  %v676_v44 = vpack.c.bf16 %v640_v42, %v640_v42  ;;  %v276_v45 = vadd.f32 %v1045_v18, %v275_v43  ;;  %v449_v46 = vpop.f32.mrf.mxu1 }
 0x138   :  { %v450_v48 = vadd.f32 %v1050_v19, %v449_v46 }
 0x139   :  { %v668_v47 = vpack.c.bf16 %v620_v13, %v620_v13  ;;  %708 = vst.msk [vmem:[%s1578_s9 + $0x74] sm:$0xf] %vm332_vm1, %v676_v44  ;;  %v322_v49 = vpack.c.bf16 %v276_v45, %v276_v45 }
 0x13a   :  { %v496_v50 = vpack.c.bf16 %v450_v48, %v450_v48 }
 0x13b   :  { %700 = vst.msk [vmem:[%s1578_s9 + $0x54] sm:$0xf] %vm332_vm1, %v668_v47 }
 0x13c   :  { %355 = vst.msk [vmem:[%s1576_s7 + $0x58] sm:$0xf] %vm332_vm1, %v322_v49  ;;  %v642_v51 = vpop.f32.mrf.mxu3 }
 0x13d   :  { %528 = vst.msk [vmem:[%s1577_s8 + $0x58] sm:$0xf] %vm332_vm1, %v496_v50  ;;  %v643_v53 = vadd.f32 %v1065_v27, %v642_v51 }
 0x13e   :  { %v622_v52 = vpop.f32.mrf.mxu2  ;;  %v277_v55 = vpop.f32.mrf.mxu0 }
 0x13f   :  { %v623_v54 = vadd.f32 %v1065_v27, %v622_v52  ;;  %v677_v56 = vpack.c.bf16 %v643_v53, %v643_v53  ;;  %v278_v57 = vadd.f32 %v1045_v18, %v277_v55  ;;  %v451_v58 = vpop.f32.mrf.mxu1 }
 0x140   :  { %v452_v60 = vadd.f32 %v1050_v19, %v451_v58 }
 0x141   :  { %v669_v59 = vpack.c.bf16 %v623_v54, %v623_v54  ;;  %709 = vst.msk [vmem:[%s1578_s9 + $0x78] sm:$0xf] %vm332_vm1, %v677_v56  ;;  %v323_v61 = vpack.c.bf16 %v278_v57, %v278_v57 }
 0x142   :  { %v497_v62 = vpack.c.bf16 %v452_v60, %v452_v60 }
 0x143   :  { %701 = vst.msk [vmem:[%s1578_s9 + $0x58] sm:$0xf] %vm332_vm1, %v669_v59 }
 0x144   :  { %356 = vst.msk [vmem:[%s1576_s7 + $0x5c] sm:$0xf] %vm332_vm1, %v323_v61  ;;  %v644_v18 = vpop.f32.mrf.mxu3 }
 0x145   :  { %529 = vst.msk [vmem:[%s1577_s8 + $0x5c] sm:$0xf] %vm332_vm1, %v497_v62  ;;  %v645_v63 = vadd.f32 %v1065_v27, %v644_v18 }
 0x146   :  { %v624_v19 = vpop.f32.mrf.mxu2 }
 0x147   :  { %v625_v0 = vadd.f32 %v1065_v27, %v624_v19  ;;  %v678_v1 = vpack.c.bf16 %v645_v63, %v645_v63 }
 0x149   :  { %v670_v2 = vpack.c.bf16 %v625_v0, %v625_v0  ;;  %710 = vst.msk [vmem:[%s1578_s9 + $0x7c] sm:$0xf] %vm332_vm1, %v678_v1 }
 0x14b   :  { %702 = vst.msk [vmem:[%s1578_s9 + $0x5c] sm:$0xf] %vm332_vm1, %v670_v2 }

</bundles_post_ra>
